<compile_context>
chip_gen: v7x
topology: tpu7x:2x2x1
jax: 0.10.0
libtpu: 0.0.40
codegen_flags: <defaults>
</compile_context>

<pallas_src>
import functools

import jax
import jax.numpy as jnp
from jax.experimental import pallas as pl
from jax.experimental.pallas import tpu as pltpu

_LANE = 128      # vreg lane width
_SUBLANE = 8     # f32 sublane count


def _round_up(n, m):
    return ((n + m - 1) // m) * m


def mlp_kernel(x_ref, w_enc_ref, b_enc_ref, w_dec_ref, b_dec_ref,
               out_ref, hidden_ref):
    # encoder: hidden = x @ W_enc + b_enc   (MXU matmul, f32 accumulation)
    hidden = jnp.dot(x_ref[...], w_enc_ref[...],
                     preferred_element_type=jnp.float32) + b_enc_ref[...]
    hidden_ref[...] = hidden.astype(hidden_ref.dtype)        # repres['hidden']

    # ReLU (VPU) -- not stored; the wrapper recomputes it from `hidden`.
    hidden_relu = jnp.maximum(hidden, 0.0)

    # decoder: out = relu(hidden) @ W_dec + b_dec
    out = jnp.dot(hidden_relu.astype(w_dec_ref.dtype), w_dec_ref[...],
                  preferred_element_type=jnp.float32) + b_dec_ref[...]
    out_ref[...] = out.astype(out_ref.dtype)                  # repres['output']


@functools.partial(jax.jit, static_argnames=("block_batch",))
def net_forward(x, w_enc, b_enc, w_dec, b_dec, *, block_batch=512):
    """Forward pass of Net. Returns (output, hidden, hidden_relu) — the latter
    two mirror the module's self.repres dict."""
    batch, input_size = x.shape
    hidden_size = w_enc.shape[1]
    output_size = w_dec.shape[1]
    dtype = x.dtype

    # --- lane-dense padding of the feature dims (zero pad => math unchanged) ---
    hid_p = _round_up(hidden_size, _LANE)
    out_p = _round_up(output_size, _LANE)
    w_enc_p = jnp.pad(w_enc, ((0, 0), (0, hid_p - hidden_size)))
    b_enc_p = jnp.pad(b_enc, ((0, 0), (0, hid_p - hidden_size)))
    w_dec_p = jnp.pad(w_dec, ((0, hid_p - hidden_size), (0, out_p - output_size)))
    b_dec_p = jnp.pad(b_dec, ((0, 0), (0, out_p - output_size)))

    # --- batch tiling (multiple of 8 sublanes; pad batch rows with zeros) ---
    tb = min(block_batch, _round_up(batch, _SUBLANE))
    batch_p = _round_up(batch, tb)
    x_p = jnp.pad(x, ((0, batch_p - batch), (0, 0)))
    n_tiles = batch_p // tb

    out_shapes = (
        jax.ShapeDtypeStruct((batch_p, out_p), dtype),   # output (padded)
        jax.ShapeDtypeStruct((batch_p, hid_p), dtype),   # hidden (padded)
    )

    out_pad, hidden_pad = pl.pallas_call(
        mlp_kernel,
        out_shape=out_shapes,
        grid_spec=pltpu.PrefetchScalarGridSpec(
            num_scalar_prefetch=0,
            grid=(n_tiles,),
            in_specs=[
                pl.BlockSpec((tb, input_size), lambda i: (i, 0)),   # x tile
                pl.BlockSpec((input_size, hid_p), lambda i: (0, 0)),  # W_enc (VMEM-resident)
                pl.BlockSpec((1, hid_p), lambda i: (0, 0)),           # b_enc
                pl.BlockSpec((hid_p, out_p), lambda i: (0, 0)),       # W_dec
                pl.BlockSpec((1, out_p), lambda i: (0, 0)),           # b_dec
            ],
            out_specs=[
                pl.BlockSpec((tb, out_p), lambda i: (i, 0)),
                pl.BlockSpec((tb, hid_p), lambda i: (i, 0)),
            ],
        ),
        compiler_params=pltpu.CompilerParams(
            dimension_semantics=("parallel",),   # lets v7x's 2 TCs split batch tiles
        ),
    )(x_p, w_enc_p, b_enc_p, w_dec_p, b_dec_p)

    # Slice off padding; recompute the cheap ReLU view outside the kernel.
    output = out_pad[:batch, :output_size]
    hidden = hidden_pad[:batch, :hidden_size]
    hidden_relu = jnp.maximum(hidden, 0.0)
    return output, hidden, hidden_relu


def init_params(key, input_size, hidden_size, output_size, dtype=jnp.float32):
    """Deterministic init mimicking nn.Linear's uniform(-1/sqrt(fan_in), 1/sqrt(fan_in))."""
    k1, k2, k3, k4 = jax.random.split(key, 4)
    bound_enc = 1.0 / jnp.sqrt(input_size)
    bound_dec = 1.0 / jnp.sqrt(hidden_size)
    w_enc = jax.random.uniform(k1, (input_size, hidden_size), dtype,
                               minval=-bound_enc, maxval=bound_enc)
    b_enc = jax.random.uniform(k2, (1, hidden_size), dtype,
                               minval=-bound_enc, maxval=bound_enc)
    w_dec = jax.random.uniform(k3, (hidden_size, output_size), dtype,
                               minval=-bound_dec, maxval=bound_dec)
    b_dec = jax.random.uniform(k4, (1, output_size), dtype,
                               minval=-bound_dec, maxval=bound_dec)
    return w_enc, b_enc, w_dec, b_dec


if __name__ == "__main__":
    input_size, hidden_size, output_size = 32, 32, 16
    batch = 8

    key = jax.random.PRNGKey(0)
    kx, kp = jax.random.split(key)
    x = jax.random.normal(kx, (batch, input_size), jnp.float32)
    w_enc, b_enc, w_dec, b_dec = init_params(kp, input_size, hidden_size, output_size)

    out, hidden, hidden_relu = net_forward(x, w_enc, b_enc, w_dec, b_dec)
    jax.block_until_ready(out)

    # Reference check in plain JAX (same math as the PyTorch forward).
    h_ref = x @ w_enc + b_enc
    hr_ref = jnp.maximum(h_ref, 0.0)
    o_ref = hr_ref @ w_dec + b_dec
    assert jnp.allclose(hidden, h_ref, atol=1e-5)
    assert jnp.allclose(hidden_relu, hr_ref, atol=1e-5)
    assert jnp.allclose(out, o_ref, atol=1e-5)

    # Also exercise the batched / multi-tile path (grid > 1, ragged batch).
    big_batch = 1030
    xb = jax.random.normal(jax.random.PRNGKey(1), (big_batch, input_size), jnp.float32)
    ob, hb, hrb = net_forward(xb, w_enc, b_enc, w_dec, b_dec)
    jax.block_until_ready(ob)
    hb_ref = xb @ w_enc + b_enc
    ob_ref = jnp.maximum(hb_ref, 0.0) @ w_dec + b_dec
    assert jnp.allclose(hb, hb_ref, atol=1e-4)
    assert jnp.allclose(ob, ob_ref, atol=1e-4)

    print("KERNEL_OK")
</pallas_src>

<mosaic_0001>
module attributes {stable_mosaic.version = 11 : i64} {
  func.func @mlp_kernel(%arg0: i32, %arg1: memref<8x32xf32, #tpu.memory_space<vmem>>, %arg2: memref<32x128xf32, #tpu.memory_space<vmem>>, %arg3: memref<1x128xf32, #tpu.memory_space<vmem>>, %arg4: memref<128x128xf32, #tpu.memory_space<vmem>>, %arg5: memref<1x128xf32, #tpu.memory_space<vmem>>, %arg6: memref<8x128xf32, #tpu.memory_space<vmem>>, %arg7: memref<8x128xf32, #tpu.memory_space<vmem>>) attributes {dimension_semantics = [#tpu.dimension_semantics<parallel>], iteration_bounds = array<i64: 1>, scalar_prefetch = 0 : i64, scratch_operands = 0 : i64, tpu.core_type = #tpu.core_type<tc>, window_params = [{transform_indices = @transform_0, window_bounds = array<i64: 8, 32>}, {pipeline_mode = #tpu.pipeline_mode<synchronous>, transform_indices = @transform_1, window_bounds = array<i64: 32, 128>}, {pipeline_mode = #tpu.pipeline_mode<synchronous>, transform_indices = @transform_2, window_bounds = array<i64: 1, 128>}, {pipeline_mode = #tpu.pipeline_mode<synchronous>, transform_indices = @transform_3, window_bounds = array<i64: 128, 128>}, {pipeline_mode = #tpu.pipeline_mode<synchronous>, transform_indices = @transform_4, window_bounds = array<i64: 1, 128>}, {transform_indices = @transform_5, window_bounds = array<i64: 8, 128>}, {transform_indices = @transform_6, window_bounds = array<i64: 8, 128>}]} {
    %c0 = arith.constant 0 : index
    %c0_0 = arith.constant 0 : index
    %0 = vector.load %arg1[%c0, %c0_0] : memref<8x32xf32, #tpu.memory_space<vmem>>, vector<8x32xf32>
    %c0_1 = arith.constant 0 : index
    %c0_2 = arith.constant 0 : index
    %1 = vector.load %arg2[%c0_1, %c0_2] : memref<32x128xf32, #tpu.memory_space<vmem>>, vector<32x128xf32>
    %cst = arith.constant dense<0.000000e+00> : vector<8x128xf32>
    %2 = tpu.matmul %0, %1, %cst {dimension_numbers = #tpu.dot_dimension_numbers<[1], [0], [0], [1], [0, 0, 1, 1], [], []>} : vector<8x32xf32>, vector<32x128xf32>, vector<8x128xf32> -> vector<8x128xf32>
    %c0_3 = arith.constant 0 : index
    %c0_4 = arith.constant 0 : index
    %3 = vector.load %arg3[%c0_3, %c0_4] : memref<1x128xf32, #tpu.memory_space<vmem>>, vector<1x128xf32>
    %4 = vector.broadcast %3 : vector<1x128xf32> to vector<8x128xf32>
    %5 = arith.addf %2, %4 : vector<8x128xf32>
    %c0_5 = arith.constant 0 : index
    %c0_6 = arith.constant 0 : index
    %6 = vector.load %arg7[%c0_5, %c0_6] : memref<8x128xf32, #tpu.memory_space<vmem>>, vector<8x128xf32>
    tpu.vector_store %arg7[%c0_5, %c0_6], %5 {strides = array<i32>} : memref<8x128xf32, #tpu.memory_space<vmem>>, vector<8x128xf32>,
    %cst_7 = arith.constant 0.000000e+00 : f32
    %7 = vector.broadcast %cst_7 : f32 to vector<8x128xf32>
    %8 = arith.maximumf %5, %7 : vector<8x128xf32>
    %c0_8 = arith.constant 0 : index
    %c0_9 = arith.constant 0 : index
    %9 = vector.load %arg4[%c0_8, %c0_9] : memref<128x128xf32, #tpu.memory_space<vmem>>, vector<128x128xf32>
    %cst_10 = arith.constant dense<0.000000e+00> : vector<8x128xf32>
    %10 = tpu.matmul %8, %9, %cst_10 {dimension_numbers = #tpu.dot_dimension_numbers<[1], [0], [0], [1], [0, 0, 1, 1], [], []>} : vector<8x128xf32>, vector<128x128xf32>, vector<8x128xf32> -> vector<8x128xf32>
    %c0_11 = arith.constant 0 : index
    %c0_12 = arith.constant 0 : index
    %11 = vector.load %arg5[%c0_11, %c0_12] : memref<1x128xf32, #tpu.memory_space<vmem>>, vector<1x128xf32>
    %12 = vector.broadcast %11 : vector<1x128xf32> to vector<8x128xf32>
    %13 = arith.addf %10, %12 : vector<8x128xf32>
    %c0_13 = arith.constant 0 : index
    %c0_14 = arith.constant 0 : index
    %14 = vector.load %arg6[%c0_13, %c0_14] : memref<8x128xf32, #tpu.memory_space<vmem>>, vector<8x128xf32>
    tpu.vector_store %arg6[%c0_13, %c0_14], %13 {strides = array<i32>} : memref<8x128xf32, #tpu.memory_space<vmem>>, vector<8x128xf32>,
    return
  }
  func.func @transform_0(%arg0: i32) -> (i32, i32) {
    %c0_i32 = arith.constant 0 : i32
    %c0_i32_0 = arith.constant 0 : i32
    return %arg0, %c0_i32 : i32, i32
  }
  func.func @transform_1(%arg0: i32) -> (i32, i32) {
    %c0_i32 = arith.constant 0 : i32
    %c0_i32_0 = arith.constant 0 : i32
    %c0_i32_1 = arith.constant 0 : i32
    return %c0_i32, %c0_i32_0 : i32, i32
  }
  func.func @transform_2(%arg0: i32) -> (i32, i32) {
    %c0_i32 = arith.constant 0 : i32
    %c0_i32_0 = arith.constant 0 : i32
    %c0_i32_1 = arith.constant 0 : i32
    return %c0_i32, %c0_i32_0 : i32, i32
  }
  func.func @transform_3(%arg0: i32) -> (i32, i32) {
    %c0_i32 = arith.constant 0 : i32
    %c0_i32_0 = arith.constant 0 : i32
    %c0_i32_1 = arith.constant 0 : i32
    return %c0_i32, %c0_i32_0 : i32, i32
  }
  func.func @transform_4(%arg0: i32) -> (i32, i32) {
    %c0_i32 = arith.constant 0 : i32
    %c0_i32_0 = arith.constant 0 : i32
    %c0_i32_1 = arith.constant 0 : i32
    return %c0_i32, %c0_i32_0 : i32, i32
  }
  func.func @transform_5(%arg0: i32) -> (i32, i32) {
    %c0_i32 = arith.constant 0 : i32
    %c0_i32_0 = arith.constant 0 : i32
    return %arg0, %c0_i32 : i32, i32
  }
  func.func @transform_6(%arg0: i32) -> (i32, i32) {
    %c0_i32 = arith.constant 0 : i32
    %c0_i32_0 = arith.constant 0 : i32
    return %arg0, %c0_i32 : i32, i32
  }
}

</mosaic_0001>

<bundles_post_ra>
// kernel: net_forward.1
= control target key start
LH: loop header
LB: loop body
LE: loop exit
PB: predicated region body
PF: predicated region fallthrough
CT: control target
= control target key end

     0   :  { %v352_v3 = vmov 0.0|0.0   ;;  %vm353_vm0 = vmmov 0   ;;  %v354_v6 = vmov 0.0   ;;  %s475_s0 = inlined_call_operand.vmem [shape: f32[8,32], index: 0, kind: input, shape index: {}]   ;;  %s476_s1 = inlined_call_operand.vmem [shape: f32[32,128], index: 1, kind: input, shape index: {}]   ;;  %s477_s2 = inlined_call_operand.vmem [shape: f32[1,128], index: 2, kind: input, shape index: {}]   ;;  %s478_s3 = inlined_call_operand.vmem [shape: f32[128,128], index: 3, kind: input, shape index: {}]   ;;  %s479_s4 = inlined_call_operand.vmem [shape: f32[1,128], index: 4, kind: input, shape index: {}]   ;;  %s480_s5 = inlined_call_operand.hbm [shape: f32[8,128], index: 5, kind: output, shape index: {0}]   ;;  %s481_s6 = inlined_call_operand.vmem [shape: f32[8,128], index: 6, kind: output, shape index: {1}]  }
   0x1   :  { %v24_v0 = vld [vmem:[%s476_s1] sm:$0xff]  ;;  %v25_v1 = vld [vmem:[%s476_s1 + $0x8] sm:$0xff]  ;;  %v26_v2 = vld [vmem:[%s476_s1 + $0x10] sm:$0xff]  ;;  %294 = vmatprep.subr.bf16.mxu0 %v352_v3  ;;  %256 = vmatprep.mubr.msk.f32.mxu0 %vm353_vm0, %v354_v6 }
   0x2   :  { %v295_v4 = vpack.c.bf16 %v25_v1, %v24_v0  ;;  %v27_v5 = vld [vmem:[%s476_s1 + $0x18] sm:$0xff]  ;;  %v111_v7 = vld [vmem:[%s478_s3] sm:$0xff]  ;;  %300 = vmatprep.subr.bf16.mxu1 %v352_v3  ;;  %v112_v8 = vld [vmem:[%s478_s3 + $0x8] sm:$0xff]  ;;  %291 = vmatprep.mubr.msk.f32.mxu1 %vm353_vm0, %v354_v6 }
   0x3   :  { %v113_v9 = vld [vmem:[%s478_s3 + $0x10] sm:$0xff]  ;;  %v114_v10 = vld [vmem:[%s478_s3 + $0x18] sm:$0xff]  ;;  %v298_v11 = vpack.c.bf16 %v27_v5, %v26_v2  ;;  %v301_v12 = vpack.c.bf16 %v112_v8, %v111_v7  ;;  %v115_v14 = vld [vmem:[%s478_s3 + $0x20] sm:$0xff] }
   0x4   :  { %296 = vmatpush3.bf16.msra.mxu0 %v295_v4  ;;  %v304_v13 = vpack.c.bf16 %v114_v10, %v113_v9  ;;  %v116_v15 = vld [vmem:[%s478_s3 + $0x28] sm:$0xff] }
   0x5   :  { %297 = vmatprep.subr.bf16.mxu0 %v352_v3  ;;  %302 = vmatpush3.bf16.msra.mxu1 %v301_v12 }
   0x6   :  { %303 = vmatprep.subr.bf16.mxu1 %v352_v3 }
   0x7   :  { %12 = vsyncpa [#allocation3], 0  ;;  %v23_v16 = vld [vmem:[%s475_s0] sm:$0xff]  ;;  %vm35_vm1 = vcmask 261120   ;;  %v307_v17 = vpack.c.bf16 %v116_v15, %v115_v14  ;;  %v117_v18 = vld [vmem:[%s478_s3 + $0x30] sm:$0xff] }
   0x8   :  { %299 = vmatpush3.bf16.msra.mxu0 %v298_v11  ;;  %v118_v19 = vld [vmem:[%s478_s3 + $0x38] sm:$0xff]  ;;  %v119_v21 = vld [vmem:[%s478_s3 + $0x40] sm:$0xff]  ;;  %v120_v22 = vld [vmem:[%s478_s3 + $0x48] sm:$0xff] }
   0x9   :  { %305 = vmatpush3.bf16.msra.mxu1 %v304_v13  ;;  %v310_v20 = vpack.c.bf16 %v118_v19, %v117_v18  ;;  %v313_v23 = vpack.c.bf16 %v120_v22, %v119_v21  ;;  %v121_v24 = vld [vmem:[%s478_s3 + $0x50] sm:$0xff]  ;;  %v122_v25 = vld [vmem:[%s478_s3 + $0x58] sm:$0xff]  ;;  %v123_v27 = vld [vmem:[%s478_s3 + $0x60] sm:$0xff] }
   0xa   :  { %306 = vmatprep.subr.bf16.mxu1 %v352_v3  ;;  %v316_v26 = vpack.c.bf16 %v122_v25, %v121_v24  ;;  %v124_v28 = vld [vmem:[%s478_s3 + $0x68] sm:$0xff]  ;;  %v125_v30 = vld [vmem:[%s478_s3 + $0x70] sm:$0xff]  ;;  %v126_v31 = vld [vmem:[%s478_s3 + $0x78] sm:$0xff]  ;;  %s355_s3 = smov [#allocation2]  }
   0xb   :  { %257 = vmatmul.mubr.msk.f32.vlgmr.msra.gmra.mrb[0].mxu0 %vm35_vm1, %v23_v16  ;;  %v319_v29 = vpack.c.bf16 %v124_v28, %v123_v27  ;;  %v322_v32 = vpack.c.bf16 %v126_v31, %v125_v30  ;;  %v223_v33 = vld [vmem:[%s477_s2] ss:$0 sm:$0xff]  ;;  %s211_s18 = sshll.u32 %s355_s3, 4  ;;  %s212_s18 = int_to_ptr.vmem [resolvable:$true] %s211_s18 }
   0xc   :  { %v225_v38 = vld [vmem:[%s479_s4] ss:$0 sm:$0xff]  ;;  %s328_s2 = scalar_lea.vmem %s212_s18, 128  ;;  %p333_p1 = scmp.lt.s32.totalorder %s212_s18, %s212_s18 }
   0xd   :  { %308 = vmatpush3.bf16.msra.mxu1 %v307_v17  ;;  %p329_p0 = scmp.ne.s32.totalorder %s212_s18, %s328_s2  ;;  %p334_p2 = scmp.lt.s32.totalorder %s328_s2, %s328_s2 }
   0xe   :  { %309 = vmatprep.subr.bf16.mxu1 %v352_v3 }
   0xf   :  { %p335_p3 = por %p334_p2, %p333_p1 }
  0x11   :  { %311 = vmatpush3.bf16.msra.mxu1 %v310_v20  ;;  %p336_p4 = pnand %p335_p3, %p329_p0 }
  0x12   :  { %312 = vmatprep.subr.bf16.mxu1 %v352_v3 }
  0x15   :  { %314 = vmatpush3.bf16.msra.mxu1 %v313_v23 }
  0x16   :  { %315 = vmatprep.subr.bf16.mxu1 %v352_v3 }
  0x19   :  { %317 = vmatpush3.bf16.msra.mxu1 %v316_v26 }
  0x1a   :  { %318 = vmatprep.subr.bf16.mxu1 %v352_v3 }
  0x1d   :  { %320 = vmatpush3.bf16.msra.mxu1 %v319_v29 }
  0x1e   :  { %321 = vmatprep.subr.bf16.mxu1 %v352_v3 }
  0x21   :  { %323 = vmatpush3.bf16.msra.mxu1 %v322_v32 }
  0xde   :  { %v105_v34 = vpop.f32.mrb[0].mxu0 }
  0xdf   :  { %v106_v35 = vadd.f32 %v223_v33, %v105_v34  ;;  %v258_v36 = vpop.f32.mrb[1].mxu0 }
  0xe1   :  { %109 = vst [vmem:[%s481_s6] sm:$0xff] %v106_v35  ;;  %v110_v37 = vmax.f32 %v106_v35, 0.0 }
  0xe3   :  { %292 = vmatmul.mubr.f32.vlgmr.msra.gmra.mrb[0].mxu1 %v110_v37 }
 0x1b6   :  { %v200_v39 = vpop.f32.mrb[0].mxu1 }
 0x1b7   :  { %v201_v40 = vadd.f32 %v225_v38, %v200_v39  ;;  %v293_v41 = vpop.f32.mrb[1].mxu1 }
 0x1b9   :  { %204 = vst [vmem:[#allocation2] sm:$0xff] %v201_v40 }
 0x1ba   :  { %339 = shalt.err (!%p336_p4)
}
 0x1bb   :  { %s340_s20 = scalar_lea.hbm %s480_s5, 128 }
 0x1bc   :  { %p341_p5 = scmp.ne.s32.totalorder %s480_s5, %s340_s20  ;;  %p344_p6 = scmp.lt.u32.totalorder %s340_s20, %s480_s5 }
 0x1be   :  { %p346_p7 = pnand %p344_p6, %p341_p5 }
 0x1c0   :  { %349 = shalt.err (!%p346_p7)
}
 0x1c1   :  { %214 = dma.vmem_to_hbm [thread:$0]  %s212_s18, 128, %s480_s5, [#allocation3]  }
 0x1c2   :  { %350 = dma.done.wait [#allocation3], 128  }
 0x1c3   :  { %351 = vsyncadd [#allocation3], 4294967168 }
 0x1c4   :  { %222 = vsyncpa [#allocation3], 1 }

</bundles_post_ra>
